<compile_context>
chip_gen: v6e
topology: v6e:2x2x1
jax: 0.10.0
libtpu: 0.0.40
codegen_flags: <defaults>
</compile_context>

<pallas_src>
import math

import jax
import jax.numpy as jnp
from jax.experimental import pallas as pl
from jax.experimental.pallas import tpu as pltpu


_INV_SQRT2 = 0.7071067811865476


def _gelu_exact(x):
    # PyTorch nn.GELU() default = exact erf-based GELU.
    return 0.5 * x * (1.0 + jax.lax.erf(x * _INV_SQRT2))


def mlp_block_kernel(x_ref, gamma_ref, beta_ref, w1_ref, b1_ref, w2_ref, b2_ref,
                     out_ref, xn_ref, acc_ref):
    """Grid = (row_tiles, hidden_chunks).  Row axis 'parallel'; hidden axis is
    an 'arbitrary' reduction accumulated in f32 scratch."""
    j = pl.program_id(1)

    @pl.when(j == 0)
    def _init():
        # ---- LayerNorm over last axis in f32 (eps matches PyTorch 1e-5) ----
        x = x_ref[...].astype(jnp.float32)                     # (TM, E)
        mean = jnp.mean(x, axis=-1, keepdims=True)
        c = x - mean
        var = jnp.mean(c * c, axis=-1, keepdims=True)          # biased variance
        xn = c * jax.lax.rsqrt(var + 1e-5)
        xn = xn * gamma_ref[...].astype(jnp.float32) + beta_ref[...].astype(jnp.float32)
        # Store once in the matmul operand dtype (bf16 weights -> bf16 xn:
        # native MXU path, half the scratch bytes).
        xn_ref[...] = xn.astype(xn_ref.dtype)
        acc_ref[...] = jnp.zeros_like(acc_ref)

    # ---- Linear1 chunk (E -> TMC) + GELU, f32 accumulation on the MXU ----
    h = jnp.dot(xn_ref[...], w1_ref[...], preferred_element_type=jnp.float32)
    h = h + b1_ref[...].astype(jnp.float32)
    h = _gelu_exact(h)
    # TODO(synk): nn.Dropout(p=0.1) -> identity (inference); training-mode
    # dropout would mask here via pltpu.prng_seed + pltpu.prng_random_bits.

    # ---- Linear2 chunk (TMC -> E), accumulated across hidden chunks ----
    acc_ref[...] += jnp.dot(h.astype(w2_ref.dtype), w2_ref[...],
                            preferred_element_type=jnp.float32)

    @pl.when(j == pl.num_programs(1) - 1)
    def _finalize():
        y = acc_ref[...] + b2_ref[...].astype(jnp.float32)
        out_ref[...] = y.astype(out_ref.dtype)


def _round_up(a, b):
    return ((a + b - 1) // b) * b


def _round_down(a, b):
    return (a // b) * b


def _vmem_limit_bytes():
    """Per-TensorCore scoped-VMEM limit with headroom (v7x has 64 MiB/TC)."""
    try:
        cap = int(pltpu.get_tpu_info().vmem_capacity_bytes)
    except Exception:
        cap = 64 << 20                       # conservative fallback = v7x per-TC
    cap = max(min(cap, 128 << 20), 32 << 20)
    if cap <= (64 << 20):                    # v7x-class core: clamp to ~48 MiB
        limit = min(cap - (12 << 20), 48 << 20)
    else:                                    # v5e / v6e: 128 MiB physical
        limit = min(cap - (16 << 20), 96 << 20)
    return max(limit, 16 << 20)


def _vmem_need(tm, tmc, E, x_item, w_item, n_chunks):
    """Rough VMEM residency for one row tile and one hidden chunk."""
    wbuf = 1 if n_chunks == 1 else 2          # invariant weights -> Buffered(1)
    weights = wbuf * 2 * E * tmc * w_item     # w1 chunk + w2 chunk
    vecs = 2 * (3 * E + tmc) * 4              # gamma / beta / b2 / b1 chunk
    io = 2 * 2 * tm * E * x_item              # double-buffered x and out tiles
    scratch = tm * E * (w_item + 4)           # xn scratch + f32 accumulator
    live = tm * (2 * E * 4 + tmc * (4 + w_item))  # f32 temps + hidden chunk copies
    return weights + vecs + io + scratch + live


def _choose_tiles(N, E, M, x_item, w_item, budget):
    """Pick (row tile TM, hidden chunk TMC).  TM is MXU-aligned (multiples of
    256 also satisfy v5e's 128); TMC always divides M so no garbage columns can
    leak into the accumulator."""
    SUB, MXU = 8, 256

    n_al = _round_up(N, SUB)
    tm = min(n_al, 1024)
    if tm > MXU:
        tm = _round_down(tm, MXU)
    if n_al >= 2 * MXU:                       # keep >= 2 row tiles (v7x megacore)
        tm = min(tm, max(MXU, _round_down(n_al // 2, MXU)))
    tm = max(tm, SUB)

    cands = [M] + sorted({c for c in range(128, M, 128) if M % c == 0},
                         reverse=True)

    def first_fit(tm_):
        for c in cands:
            if _vmem_need(tm_, c, E, x_item, w_item, M // c) <= budget:
                return c
        return None

    tmc = first_fit(tm)
    while tmc is None and tm > SUB:
        tm = max(SUB, _round_down(tm // 2, MXU) or _round_down(tm // 2, SUB))
        tmc = first_fit(tm)
    if tmc is None:
        tmc = cands[-1]
    return tm, tmc


def mlp_block(x, gamma, beta, w1, b1, w2, b2):
    """x: (B, S, E).  w1: (E, M), b1: (M,), w2: (M, E), b2: (E,).
    Weights may be bf16 (recommended on v6e/v7x); matmuls accumulate in f32."""
    B, S, E = x.shape
    M = w1.shape[1]
    N = B * S
    # No explicit padding: Pallas masks OOB writes on a ragged last row tile,
    # and garbage rows are row-local to LayerNorm/GELU (sliced off by masking).
    x2d = x.reshape(N, E)

    x_item = jnp.dtype(x.dtype).itemsize
    w_item = jnp.dtype(w1.dtype).itemsize
    vmem_limit = _vmem_limit_bytes()
    TM, TMC = _choose_tiles(N, E, M, x_item, w_item, int(vmem_limit * 0.8))
    n_row = pl.cdiv(N, TM)
    n_chk = M // TMC

    gamma2 = gamma.reshape(1, E)
    beta2 = beta.reshape(1, E)
    b1_2 = b1.reshape(1, M)
    b2_2 = b2.reshape(1, E)

    # Deployed E (768) keeps the output lane-dense; tiny test E (< 128) would
    # need wrapper-side feature folding on v5e, skipped here for clarity.
    w_stream = 1 if n_chk == 1 else n_row     # chunked weights re-stream per row tile
    cost = pl.CostEstimate(
        flops=4 * N * E * M,
        transcendentals=N * M,                # erf per hidden element
        bytes_accessed=(2 * N * E * x_item
                        + 2 * E * M * w_item * w_stream
                        + (M + 3 * E) * 4),
    )

    def build_and_run(single_buffer_invariants):
        def spec(shape, imap, invariant):
            if single_buffer_invariants and invariant:
                return pl.BlockSpec(shape, imap, pipeline_mode=pl.Buffered(1))
            return pl.BlockSpec(shape, imap)

        w_inv = (n_chk == 1)                  # weights grid-invariant iff unchunked
        grid_spec = pltpu.PrefetchScalarGridSpec(
            num_scalar_prefetch=0,
            grid=(n_row, n_chk),
            in_specs=[
                pl.BlockSpec((TM, E), lambda i, j: (i, 0)),   # x rows
                spec((1, E), lambda i, j: (0, 0), True),      # gamma
                spec((1, E), lambda i, j: (0, 0), True),      # beta
                spec((E, TMC), lambda i, j: (0, j), w_inv),   # w1 chunk
                spec((1, TMC), lambda i, j: (0, j), w_inv),   # b1 chunk
                spec((TMC, E), lambda i, j: (j, 0), w_inv),   # w2 chunk
                spec((1, E), lambda i, j: (0, 0), True),      # b2
            ],
            out_specs=pl.BlockSpec((TM, E), lambda i, j: (i, 0)),
            scratch_shapes=[
                pltpu.VMEM((TM, E), w1.dtype),      # LayerNorm output (operand dtype)
                pltpu.VMEM((TM, E), jnp.float32),   # f32 output accumulator
            ],
        )
        return pl.pallas_call(
            mlp_block_kernel,
            out_shape=jax.ShapeDtypeStruct((N, E), x.dtype),
            grid_spec=grid_spec,
            compiler_params=pltpu.CompilerParams(
                dimension_semantics=("parallel", "arbitrary"),
                vmem_limit_bytes=int(vmem_limit),
            ),
            cost_estimate=cost,
        )(x2d, gamma2, beta2, w1, b1_2, w2, b2_2)

    try:
        out2d = build_and_run(True)
    except Exception:
        # Fallback for Pallas versions without single-buffer pipeline_mode.
        out2d = build_and_run(False)

    return out2d.reshape(B, S, E)


def reference(x, gamma, beta, w1, b1, w2, b2):
    """Pure-JAX reference mirroring the kernel's dtype policy."""
    xf = x.astype(jnp.float32)
    mean = jnp.mean(xf, axis=-1, keepdims=True)
    var = jnp.mean((xf - mean) ** 2, axis=-1, keepdims=True)
    xn = (xf - mean) * jax.lax.rsqrt(var + 1e-5)
    xn = xn * gamma.astype(jnp.float32) + beta.astype(jnp.float32)
    h = jnp.dot(xn.astype(w1.dtype), w1, preferred_element_type=jnp.float32)
    h = h + b1.astype(jnp.float32)
    h = 0.5 * h * (1.0 + jax.lax.erf(h * _INV_SQRT2))
    y = jnp.dot(h.astype(w2.dtype), w2, preferred_element_type=jnp.float32)
    y = y + b2.astype(jnp.float32)
    return y.astype(x.dtype)


if __name__ == "__main__":
    # Small shapes consistent with MLPBlock (embedding_dim -> mlp_size -> embedding_dim).
    B, S, E, M = 2, 8, 32, 128

    key = jax.random.PRNGKey(0)
    kx, kg, kb, kw1, kb1, kw2, kb2 = jax.random.split(key, 7)

    x = jax.random.normal(kx, (B, S, E), dtype=jnp.float32)

    gamma = 1.0 + 0.01 * jax.random.normal(kg, (E,), dtype=jnp.float32)
    beta = 0.01 * jax.random.normal(kb, (E,), dtype=jnp.float32)
    # bf16 weights feed the MXU's native fast path on v6e/v7x (f32 accumulation
    # preserves accuracy); LayerNorm params stay f32 (VPU math).
    w1 = (jax.random.normal(kw1, (E, M), dtype=jnp.float32) / math.sqrt(E)).astype(jnp.bfloat16)
    b1 = (0.01 * jax.random.normal(kb1, (M,), dtype=jnp.float32)).astype(jnp.bfloat16)
    w2 = (jax.random.normal(kw2, (M, E), dtype=jnp.float32) / math.sqrt(M)).astype(jnp.bfloat16)
    b2 = (0.01 * jax.random.normal(kb2, (E,), dtype=jnp.float32)).astype(jnp.bfloat16)

    out = mlp_block(x, gamma, beta, w1, b1, w2, b2)
    out = jax.block_until_ready(out)

    ref = reference(x, gamma, beta, w1, b1, w2, b2)
    assert out.shape == (B, S, E), out.shape
    assert out.dtype == x.dtype, out.dtype
    err = float(jnp.max(jnp.abs(out.astype(jnp.float32) - ref.astype(jnp.float32))))
    assert err < 2e-2, err

    print("KERNEL_OK")
</pallas_src>

<mosaic_0001>
module attributes {stable_mosaic.version = 11 : i64} {
  func.func @mlp_block_kernel(%arg0: i32, %arg1: i32, %arg2: memref<16x32xf32, #tpu.memory_space<vmem>>, %arg3: memref<1x32xf32, #tpu.memory_space<vmem>>, %arg4: memref<1x32xf32, #tpu.memory_space<vmem>>, %arg5: memref<32x128xbf16, #tpu.memory_space<vmem>>, %arg6: memref<1x128xbf16, #tpu.memory_space<vmem>>, %arg7: memref<128x32xbf16, #tpu.memory_space<vmem>>, %arg8: memref<1x32xbf16, #tpu.memory_space<vmem>>, %arg9: memref<16x32xf32, #tpu.memory_space<vmem>>, %arg10: memref<16x32xbf16, #tpu.memory_space<vmem>>, %arg11: memref<16x32xf32, #tpu.memory_space<vmem>>) attributes {dimension_semantics = [#tpu.dimension_semantics<parallel>, #tpu.dimension_semantics<arbitrary>], iteration_bounds = array<i64: 1, 1>, scalar_prefetch = 0 : i64, scratch_operands = 2 : i64, tpu.core_type = #tpu.core_type<tc>, window_params = [{transform_indices = @transform_0, window_bounds = array<i64: 16, 32>}, {pipeline_mode = #tpu.pipeline_mode<synchronous>, transform_indices = @transform_1, window_bounds = array<i64: 1, 32>}, {pipeline_mode = #tpu.pipeline_mode<synchronous>, transform_indices = @transform_2, window_bounds = array<i64: 1, 32>}, {pipeline_mode = #tpu.pipeline_mode<synchronous>, transform_indices = @transform_3, window_bounds = array<i64: 32, 128>}, {pipeline_mode = #tpu.pipeline_mode<synchronous>, transform_indices = @transform_4, window_bounds = array<i64: 1, 128>}, {pipeline_mode = #tpu.pipeline_mode<synchronous>, transform_indices = @transform_5, window_bounds = array<i64: 128, 32>}, {pipeline_mode = #tpu.pipeline_mode<synchronous>, transform_indices = @transform_6, window_bounds = array<i64: 1, 32>}, {transform_indices = @transform_7, window_bounds = array<i64: 16, 32>}]} {
    %c0_i32 = arith.constant 0 : i32
    %0 = arith.cmpi eq, %arg1, %c0_i32 : i32
    %1 = arith.extui %0 : i1 to i32
    %c0_i32_0 = arith.constant 0 : i32
    %2 = arith.cmpi ne, %1, %c0_i32_0 : i32
    scf.if %2 {
      %c0_18 = arith.constant 0 : index
      %c0_19 = arith.constant 0 : index
      %27 = vector.load %arg2[%c0_18, %c0_19] : memref<16x32xf32, #tpu.memory_space<vmem>>, vector<16x32xf32>
      %cst_20 = arith.constant dense<0.000000e+00> : vector<16xf32>
      %28 = vector.multi_reduction <add>, %27, %cst_20 [1] : vector<16x32xf32> to vector<16xf32>
      %29 = vector.shape_cast %28 : vector<16xf32> to vector<16x1xf32>
      %cst_21 = arith.constant 3.200000e+01 : f32
      %30 = vector.broadcast %cst_21 : f32 to vector<16x1xf32>
      %31 = arith.divf %29, %30 : vector<16x1xf32>
      %32 = vector.broadcast %31 : vector<16x1xf32> to vector<16x32xf32>
      %33 = arith.subf %27, %32 : vector<16x32xf32>
      %34 = arith.mulf %33, %33 : vector<16x32xf32>
      %cst_22 = arith.constant dense<0.000000e+00> : vector<16xf32>
      %35 = vector.multi_reduction <add>, %34, %cst_22 [1] : vector<16x32xf32> to vector<16xf32>
      %36 = vector.shape_cast %35 : vector<16xf32> to vector<16x1xf32>
      %cst_23 = arith.constant 3.200000e+01 : f32
      %37 = vector.broadcast %cst_23 : f32 to vector<16x1xf32>
      %38 = arith.divf %36, %37 : vector<16x1xf32>
      %cst_24 = arith.constant 9.99999974E-6 : f32
      %39 = vector.broadcast %cst_24 : f32 to vector<16x1xf32>
      %40 = arith.addf %38, %39 : vector<16x1xf32>
      %41 = math.rsqrt %40 : vector<16x1xf32>
      %42 = vector.broadcast %41 : vector<16x1xf32> to vector<16x32xf32>
      %43 = arith.mulf %33, %42 : vector<16x32xf32>
      %c0_25 = arith.constant 0 : index
      %c0_26 = arith.constant 0 : index
      %44 = vector.load %arg3[%c0_25, %c0_26] : memref<1x32xf32, #tpu.memory_space<vmem>>, vector<1x32xf32>
      %45 = vector.broadcast %44 : vector<1x32xf32> to vector<16x32xf32>
      %46 = arith.mulf %43, %45 : vector<16x32xf32>
      %c0_27 = arith.constant 0 : index
      %c0_28 = arith.constant 0 : index
      %47 = vector.load %arg4[%c0_27, %c0_28] : memref<1x32xf32, #tpu.memory_space<vmem>>, vector<1x32xf32>
      %48 = vector.broadcast %47 : vector<1x32xf32> to vector<16x32xf32>
      %49 = arith.addf %46, %48 : vector<16x32xf32>
      %50 = arith.truncf %49 : vector<16x32xf32> to vector<16x32xbf16>
      %c0_29 = arith.constant 0 : index
      %c0_30 = arith.constant 0 : index
      %51 = vector.load %arg10[%c0_29, %c0_30] : memref<16x32xbf16, #tpu.memory_space<vmem>>, vector<16x32xbf16>
      tpu.vector_store %arg10[%c0_29, %c0_30], %50 {strides = array<i32>} : memref<16x32xbf16, #tpu.memory_space<vmem>>, vector<16x32xbf16>,
      %cst_31 = arith.constant 0.000000e+00 : f32
      %52 = vector.broadcast %cst_31 : f32 to vector<16x32xf32>
      %c0_32 = arith.constant 0 : index
      %c0_33 = arith.constant 0 : index
      %53 = vector.load %arg11[%c0_32, %c0_33] : memref<16x32xf32, #tpu.memory_space<vmem>>, vector<16x32xf32>
      tpu.vector_store %arg11[%c0_32, %c0_33], %52 {strides = array<i32>} : memref<16x32xf32, #tpu.memory_space<vmem>>, vector<16x32xf32>,
    } else {
    }
    %c0 = arith.constant 0 : index
    %c0_1 = arith.constant 0 : index
    %3 = vector.load %arg10[%c0, %c0_1] : memref<16x32xbf16, #tpu.memory_space<vmem>>, vector<16x32xbf16>
    %c0_2 = arith.constant 0 : index
    %c0_3 = arith.constant 0 : index
    %4 = vector.load %arg5[%c0_2, %c0_3] : memref<32x128xbf16, #tpu.memory_space<vmem>>, vector<32x128xbf16>
    %cst = arith.constant dense<0.000000e+00> : vector<16x128xf32>
    %5 = tpu.matmul %3, %4, %cst {dimension_numbers = #tpu.dot_dimension_numbers<[1], [0], [0], [1], [0, 0, 1, 1], [], []>} : vector<16x32xbf16>, vector<32x128xbf16>, vector<16x128xf32> -> vector<16x128xf32>
    %c0_4 = arith.constant 0 : index
    %c0_5 = arith.constant 0 : index
    %6 = vector.load %arg6[%c0_4, %c0_5] : memref<1x128xbf16, #tpu.memory_space<vmem>>, vector<1x128xbf16>
    %7 = arith.extf %6 : vector<1x128xbf16> to vector<1x128xf32>
    %8 = vector.broadcast %7 : vector<1x128xf32> to vector<16x128xf32>
    %9 = arith.addf %5, %8 : vector<16x128xf32>
    %cst_6 = arith.constant 5.000000e-01 : f32
    %10 = vector.broadcast %cst_6 : f32 to vector<16x128xf32>
    %11 = arith.mulf %10, %9 : vector<16x128xf32>
    %cst_7 = arith.constant 0.707106769 : f32
    %12 = vector.broadcast %cst_7 : f32 to vector<16x128xf32>
    %13 = arith.mulf %9, %12 : vector<16x128xf32>
    %14 = math.erf %13 : vector<16x128xf32>
    %cst_8 = arith.constant 1.000000e+00 : f32
    %15 = vector.broadcast %cst_8 : f32 to vector<16x128xf32>
    %16 = arith.addf %15, %14 : vector<16x128xf32>
    %17 = arith.mulf %11, %16 : vector<16x128xf32>
    %c0_9 = arith.constant 0 : index
    %c0_10 = arith.constant 0 : index
    %18 = vector.load %arg11[%c0_9, %c0_10] : memref<16x32xf32, #tpu.memory_space<vmem>>, vector<16x32xf32>
    %19 = arith.truncf %17 : vector<16x128xf32> to vector<16x128xbf16>
    %c0_11 = arith.constant 0 : index
    %c0_12 = arith.constant 0 : index
    %20 = vector.load %arg7[%c0_11, %c0_12] : memref<128x32xbf16, #tpu.memory_space<vmem>>, vector<128x32xbf16>
    %cst_13 = arith.constant dense<0.000000e+00> : vector<16x32xf32>
    %21 = tpu.matmul %19, %20, %cst_13 {dimension_numbers = #tpu.dot_dimension_numbers<[1], [0], [0], [1], [0, 0, 1, 1], [], []>} : vector<16x128xbf16>, vector<128x32xbf16>, vector<16x32xf32> -> vector<16x32xf32>
    %22 = arith.addf %18, %21 : vector<16x32xf32>
    %c0_14 = arith.constant 0 : index
    %c0_15 = arith.constant 0 : index
    %23 = vector.load %arg11[%c0_14, %c0_15] : memref<16x32xf32, #tpu.memory_space<vmem>>, vector<16x32xf32>
    tpu.vector_store %arg11[%c0_14, %c0_15], %22 {strides = array<i32>} : memref<16x32xf32, #tpu.memory_space<vmem>>, vector<16x32xf32>,
    %c0_i32_16 = arith.constant 0 : i32
    %24 = arith.cmpi eq, %arg1, %c0_i32_16 : i32
    %25 = arith.extui %24 : i1 to i32
    %c0_i32_17 = arith.constant 0 : i32
    %26 = arith.cmpi ne, %25, %c0_i32_17 : i32
    scf.if %26 {
      %c0_18 = arith.constant 0 : index
      %c0_19 = arith.constant 0 : index
      %27 = vector.load %arg11[%c0_18, %c0_19] : memref<16x32xf32, #tpu.memory_space<vmem>>, vector<16x32xf32>
      %c0_20 = arith.constant 0 : index
      %c0_21 = arith.constant 0 : index
      %28 = vector.load %arg8[%c0_20, %c0_21] : memref<1x32xbf16, #tpu.memory_space<vmem>>, vector<1x32xbf16>
      %29 = arith.extf %28 : vector<1x32xbf16> to vector<1x32xf32>
      %30 = vector.broadcast %29 : vector<1x32xf32> to vector<16x32xf32>
      %31 = arith.addf %27, %30 : vector<16x32xf32>
      %c0_22 = arith.constant 0 : index
      %c0_23 = arith.constant 0 : index
      %32 = vector.load %arg9[%c0_22, %c0_23] : memref<16x32xf32, #tpu.memory_space<vmem>>, vector<16x32xf32>
      tpu.vector_store %arg9[%c0_22, %c0_23], %31 {strides = array<i32>} : memref<16x32xf32, #tpu.memory_space<vmem>>, vector<16x32xf32>,
    } else {
    }
    return
  }
  func.func @transform_0(%arg0: i32, %arg1: i32) -> (i32, i32) {
    %c0_i32 = arith.constant 0 : i32
    %c0_i32_0 = arith.constant 0 : i32
    return %arg0, %c0_i32 : i32, i32
  }
  func.func @transform_1(%arg0: i32, %arg1: i32) -> (i32, i32) {
    %c0_i32 = arith.constant 0 : i32
    %c0_i32_0 = arith.constant 0 : i32
    %c0_i32_1 = arith.constant 0 : i32
    return %c0_i32, %c0_i32_0 : i32, i32
  }
  func.func @transform_2(%arg0: i32, %arg1: i32) -> (i32, i32) {
    %c0_i32 = arith.constant 0 : i32
    %c0_i32_0 = arith.constant 0 : i32
    %c0_i32_1 = arith.constant 0 : i32
    return %c0_i32, %c0_i32_0 : i32, i32
  }
  func.func @transform_3(%arg0: i32, %arg1: i32) -> (i32, i32) {
    %c0_i32 = arith.constant 0 : i32
    %c0_i32_0 = arith.constant 0 : i32
    return %c0_i32, %arg1 : i32, i32
  }
  func.func @transform_4(%arg0: i32, %arg1: i32) -> (i32, i32) {
    %c0_i32 = arith.constant 0 : i32
    %c0_i32_0 = arith.constant 0 : i32
    return %c0_i32, %arg1 : i32, i32
  }
  func.func @transform_5(%arg0: i32, %arg1: i32) -> (i32, i32) {
    %c0_i32 = arith.constant 0 : i32
    %c0_i32_0 = arith.constant 0 : i32
    return %arg1, %c0_i32 : i32, i32
  }
  func.func @transform_6(%arg0: i32, %arg1: i32) -> (i32, i32) {
    %c0_i32 = arith.constant 0 : i32
    %c0_i32_0 = arith.constant 0 : i32
    %c0_i32_1 = arith.constant 0 : i32
    return %c0_i32, %c0_i32_0 : i32, i32
  }
  func.func @transform_7(%arg0: i32, %arg1: i32) -> (i32, i32) {
    %c0_i32 = arith.constant 0 : i32
    %c0_i32_0 = arith.constant 0 : i32
    return %arg0, %c0_i32 : i32, i32
  }
}

module attributes {stable_mosaic.version = 11 : i64} {
  func.func @mlp_block_kernel(%arg0: i32, %arg1: i32, %arg2: memref<16x32xf32, #tpu.memory_space<vmem>>, %arg3: memref<1x32xf32, #tpu.memory_space<vmem>>, %arg4: memref<1x32xf32, #tpu.memory_space<vmem>>, %arg5: memref<32x128xbf16, #tpu.memory_space<vmem>>, %arg6: memref<1x128xbf16, #tpu.memory_space<vmem>>, %arg7: memref<128x32xbf16, #tpu.memory_space<vmem>>, %arg8: memref<1x32xbf16, #tpu.memory_space<vmem>>, %arg9: memref<16x32xf32, #tpu.memory_space<vmem>>, %arg10: memref<16x32xbf16, #tpu.memory_space<vmem>>, %arg11: memref<16x32xf32, #tpu.memory_space<vmem>>) attributes {dimension_semantics = [#tpu.dimension_semantics<parallel>, #tpu.dimension_semantics<arbitrary>], iteration_bounds = array<i64: 1, 1>, scalar_prefetch = 0 : i64, scratch_operands = 2 : i64, tpu.core_type = #tpu.core_type<tc>, window_params = [{transform_indices = @transform_0, window_bounds = array<i64: 16, 32>}, {pipeline_mode = #tpu.pipeline_mode<synchronous>, transform_indices = @transform_1, window_bounds = array<i64: 1, 32>}, {pipeline_mode = #tpu.pipeline_mode<synchronous>, transform_indices = @transform_2, window_bounds = array<i64: 1, 32>}, {transform_indices = @transform_3, window_bounds = array<i64: 32, 128>}, {transform_indices = @transform_4, window_bounds = array<i64: 1, 128>}, {transform_indices = @transform_5, window_bounds = array<i64: 128, 32>}, {pipeline_mode = #tpu.pipeline_mode<synchronous>, transform_indices = @transform_6, window_bounds = array<i64: 1, 32>}, {transform_indices = @transform_7, window_bounds = array<i64: 16, 32>}]} {
    %c0_i32 = arith.constant 0 : i32
    %0 = arith.cmpi eq, %arg1, %c0_i32 : i32
    %1 = arith.extui %0 : i1 to i32
    %c0_i32_0 = arith.constant 0 : i32
    %2 = arith.cmpi ne, %1, %c0_i32_0 : i32
    scf.if %2 {
      %c0_18 = arith.constant 0 : index
      %c0_19 = arith.constant 0 : index
      %27 = vector.load %arg2[%c0_18, %c0_19] : memref<16x32xf32, #tpu.memory_space<vmem>>, vector<16x32xf32>
      %cst_20 = arith.constant dense<0.000000e+00> : vector<16xf32>
      %28 = vector.multi_reduction <add>, %27, %cst_20 [1] : vector<16x32xf32> to vector<16xf32>
      %29 = vector.shape_cast %28 : vector<16xf32> to vector<16x1xf32>
      %cst_21 = arith.constant 3.200000e+01 : f32
      %30 = vector.broadcast %cst_21 : f32 to vector<16x1xf32>
      %31 = arith.divf %29, %30 : vector<16x1xf32>
      %32 = vector.broadcast %31 : vector<16x1xf32> to vector<16x32xf32>
      %33 = arith.subf %27, %32 : vector<16x32xf32>
      %34 = arith.mulf %33, %33 : vector<16x32xf32>
      %cst_22 = arith.constant dense<0.000000e+00> : vector<16xf32>
      %35 = vector.multi_reduction <add>, %34, %cst_22 [1] : vector<16x32xf32> to vector<16xf32>
      %36 = vector.shape_cast %35 : vector<16xf32> to vector<16x1xf32>
      %cst_23 = arith.constant 3.200000e+01 : f32
      %37 = vector.broadcast %cst_23 : f32 to vector<16x1xf32>
      %38 = arith.divf %36, %37 : vector<16x1xf32>
      %cst_24 = arith.constant 9.99999974E-6 : f32
      %39 = vector.broadcast %cst_24 : f32 to vector<16x1xf32>
      %40 = arith.addf %38, %39 : vector<16x1xf32>
      %41 = math.rsqrt %40 : vector<16x1xf32>
      %42 = vector.broadcast %41 : vector<16x1xf32> to vector<16x32xf32>
      %43 = arith.mulf %33, %42 : vector<16x32xf32>
      %c0_25 = arith.constant 0 : index
      %c0_26 = arith.constant 0 : index
      %44 = vector.load %arg3[%c0_25, %c0_26] : memref<1x32xf32, #tpu.memory_space<vmem>>, vector<1x32xf32>
      %45 = vector.broadcast %44 : vector<1x32xf32> to vector<16x32xf32>
      %46 = arith.mulf %43, %45 : vector<16x32xf32>
      %c0_27 = arith.constant 0 : index
      %c0_28 = arith.constant 0 : index
      %47 = vector.load %arg4[%c0_27, %c0_28] : memref<1x32xf32, #tpu.memory_space<vmem>>, vector<1x32xf32>
      %48 = vector.broadcast %47 : vector<1x32xf32> to vector<16x32xf32>
      %49 = arith.addf %46, %48 : vector<16x32xf32>
      %50 = arith.truncf %49 : vector<16x32xf32> to vector<16x32xbf16>
      %c0_29 = arith.constant 0 : index
      %c0_30 = arith.constant 0 : index
      %51 = vector.load %arg10[%c0_29, %c0_30] : memref<16x32xbf16, #tpu.memory_space<vmem>>, vector<16x32xbf16>
      tpu.vector_store %arg10[%c0_29, %c0_30], %50 {strides = array<i32>} : memref<16x32xbf16, #tpu.memory_space<vmem>>, vector<16x32xbf16>,
      %cst_31 = arith.constant 0.000000e+00 : f32
      %52 = vector.broadcast %cst_31 : f32 to vector<16x32xf32>
      %c0_32 = arith.constant 0 : index
      %c0_33 = arith.constant 0 : index
      %53 = vector.load %arg11[%c0_32, %c0_33] : memref<16x32xf32, #tpu.memory_space<vmem>>, vector<16x32xf32>
      tpu.vector_store %arg11[%c0_32, %c0_33], %52 {strides = array<i32>} : memref<16x32xf32, #tpu.memory_space<vmem>>, vector<16x32xf32>,
    } else {
    }
    %c0 = arith.constant 0 : index
    %c0_1 = arith.constant 0 : index
    %3 = vector.load %arg10[%c0, %c0_1] : memref<16x32xbf16, #tpu.memory_space<vmem>>, vector<16x32xbf16>
    %c0_2 = arith.constant 0 : index
    %c0_3 = arith.constant 0 : index
    %4 = vector.load %arg5[%c0_2, %c0_3] : memref<32x128xbf16, #tpu.memory_space<vmem>>, vector<32x128xbf16>
    %cst = arith.constant dense<0.000000e+00> : vector<16x128xf32>
    %5 = tpu.matmul %3, %4, %cst {dimension_numbers = #tpu.dot_dimension_numbers<[1], [0], [0], [1], [0, 0, 1, 1], [], []>} : vector<16x32xbf16>, vector<32x128xbf16>, vector<16x128xf32> -> vector<16x128xf32>
    %c0_4 = arith.constant 0 : index
    %c0_5 = arith.constant 0 : index
    %6 = vector.load %arg6[%c0_4, %c0_5] : memref<1x128xbf16, #tpu.memory_space<vmem>>, vector<1x128xbf16>
    %7 = arith.extf %6 : vector<1x128xbf16> to vector<1x128xf32>
    %8 = vector.broadcast %7 : vector<1x128xf32> to vector<16x128xf32>
    %9 = arith.addf %5, %8 : vector<16x128xf32>
    %cst_6 = arith.constant 5.000000e-01 : f32
    %10 = vector.broadcast %cst_6 : f32 to vector<16x128xf32>
    %11 = arith.mulf %10, %9 : vector<16x128xf32>
    %cst_7 = arith.constant 0.707106769 : f32
    %12 = vector.broadcast %cst_7 : f32 to vector<16x128xf32>
    %13 = arith.mulf %9, %12 : vector<16x128xf32>
    %14 = math.erf %13 : vector<16x128xf32>
    %cst_8 = arith.constant 1.000000e+00 : f32
    %15 = vector.broadcast %cst_8 : f32 to vector<16x128xf32>
    %16 = arith.addf %15, %14 : vector<16x128xf32>
    %17 = arith.mulf %11, %16 : vector<16x128xf32>
    %c0_9 = arith.constant 0 : index
    %c0_10 = arith.constant 0 : index
    %18 = vector.load %arg11[%c0_9, %c0_10] : memref<16x32xf32, #tpu.memory_space<vmem>>, vector<16x32xf32>
    %19 = arith.truncf %17 : vector<16x128xf32> to vector<16x128xbf16>
    %c0_11 = arith.constant 0 : index
    %c0_12 = arith.constant 0 : index
    %20 = vector.load %arg7[%c0_11, %c0_12] : memref<128x32xbf16, #tpu.memory_space<vmem>>, vector<128x32xbf16>
    %cst_13 = arith.constant dense<0.000000e+00> : vector<16x32xf32>
    %21 = tpu.matmul %19, %20, %cst_13 {dimension_numbers = #tpu.dot_dimension_numbers<[1], [0], [0], [1], [0, 0, 1, 1], [], []>} : vector<16x128xbf16>, vector<128x32xbf16>, vector<16x32xf32> -> vector<16x32xf32>
    %22 = arith.addf %18, %21 : vector<16x32xf32>
    %c0_14 = arith.constant 0 : index
    %c0_15 = arith.constant 0 : index
    %23 = vector.load %arg11[%c0_14, %c0_15] : memref<16x32xf32, #tpu.memory_space<vmem>>, vector<16x32xf32>
    tpu.vector_store %arg11[%c0_14, %c0_15], %22 {strides = array<i32>} : memref<16x32xf32, #tpu.memory_space<vmem>>, vector<16x32xf32>,
    %c0_i32_16 = arith.constant 0 : i32
    %24 = arith.cmpi eq, %arg1, %c0_i32_16 : i32
    %25 = arith.extui %24 : i1 to i32
    %c0_i32_17 = arith.constant 0 : i32
    %26 = arith.cmpi ne, %25, %c0_i32_17 : i32
    scf.if %26 {
      %c0_18 = arith.constant 0 : index
      %c0_19 = arith.constant 0 : index
      %27 = vector.load %arg11[%c0_18, %c0_19] : memref<16x32xf32, #tpu.memory_space<vmem>>, vector<16x32xf32>
      %c0_20 = arith.constant 0 : index
      %c0_21 = arith.constant 0 : index
      %28 = vector.load %arg8[%c0_20, %c0_21] : memref<1x32xbf16, #tpu.memory_space<vmem>>, vector<1x32xbf16>
      %29 = arith.extf %28 : vector<1x32xbf16> to vector<1x32xf32>
      %30 = vector.broadcast %29 : vector<1x32xf32> to vector<16x32xf32>
      %31 = arith.addf %27, %30 : vector<16x32xf32>
      %c0_22 = arith.constant 0 : index
      %c0_23 = arith.constant 0 : index
      %32 = vector.load %arg9[%c0_22, %c0_23] : memref<16x32xf32, #tpu.memory_space<vmem>>, vector<16x32xf32>
      tpu.vector_store %arg9[%c0_22, %c0_23], %31 {strides = array<i32>} : memref<16x32xf32, #tpu.memory_space<vmem>>, vector<16x32xf32>,
    } else {
    }
    return
  }
  func.func @transform_0(%arg0: i32, %arg1: i32) -> (i32, i32) {
    %c0_i32 = arith.constant 0 : i32
    %c0_i32_0 = arith.constant 0 : i32
    return %arg0, %c0_i32 : i32, i32
  }
  func.func @transform_1(%arg0: i32, %arg1: i32) -> (i32, i32) {
    %c0_i32 = arith.constant 0 : i32
    %c0_i32_0 = arith.constant 0 : i32
    %c0_i32_1 = arith.constant 0 : i32
    return %c0_i32, %c0_i32_0 : i32, i32
  }
  func.func @transform_2(%arg0: i32, %arg1: i32) -> (i32, i32) {
    %c0_i32 = arith.constant 0 : i32
    %c0_i32_0 = arith.constant 0 : i32
    %c0_i32_1 = arith.constant 0 : i32
    return %c0_i32, %c0_i32_0 : i32, i32
  }
  func.func @transform_3(%arg0: i32, %arg1: i32) -> (i32, i32) {
    %c0_i32 = arith.constant 0 : i32
    %c0_i32_0 = arith.constant 0 : i32
    return %c0_i32, %arg1 : i32, i32
  }
  func.func @transform_4(%arg0: i32, %arg1: i32) -> (i32, i32) {
    %c0_i32 = arith.constant 0 : i32
    %c0_i32_0 = arith.constant 0 : i32
    return %c0_i32, %arg1 : i32, i32
  }
  func.func @transform_5(%arg0: i32, %arg1: i32) -> (i32, i32) {
    %c0_i32 = arith.constant 0 : i32
    %c0_i32_0 = arith.constant 0 : i32
    return %arg1, %c0_i32 : i32, i32
  }
  func.func @transform_6(%arg0: i32, %arg1: i32) -> (i32, i32) {
    %c0_i32 = arith.constant 0 : i32
    %c0_i32_0 = arith.constant 0 : i32
    %c0_i32_1 = arith.constant 0 : i32
    return %c0_i32, %c0_i32_0 : i32, i32
  }
  func.func @transform_7(%arg0: i32, %arg1: i32) -> (i32, i32) {
    %c0_i32 = arith.constant 0 : i32
    %c0_i32_0 = arith.constant 0 : i32
    return %arg0, %c0_i32 : i32, i32
  }
}

</mosaic_0001>

<bundles_post_ra>
// kernel: tpu_custom_call.1
= control target key start
LH: loop header
LB: loop body
LE: loop exit
PB: predicated region body
PF: predicated region fallthrough
CT: control target
= control target key end

     0   :  { %vm34_vm0 = vcmask 261120   ;;  %s531_s0 = inlined_call_operand.vmem [shape: f32[16,32], index: 0, kind: input, shape index: {}]   ;;  %s532_s1 = inlined_call_operand.vmem [shape: f32[1,32], index: 1, kind: input, shape index: {}]   ;;  %s533_s2 = inlined_call_operand.vmem [shape: f32[1,32], index: 2, kind: input, shape index: {}]   ;;  %s534_s3 = inlined_call_operand.vmem [shape: bf16[32,128], index: 3, kind: input, shape index: {}]   ;;  %s535_s4 = inlined_call_operand.vmem [shape: bf16[1,128], index: 4, kind: input, shape index: {}]   ;;  %s536_s5 = inlined_call_operand.vmem [shape: bf16[128,32], index: 5, kind: input, shape index: {}]   ;;  %s537_s6 = inlined_call_operand.vmem [shape: bf16[1,32], index: 6, kind: input, shape index: {}]   ;;  %s538_s7 = inlined_call_operand.hbm [shape: f32[16,32], index: 7, kind: output, shape index: {}]  }
   0x1   :  { %v32_v0 = vld [vmem:[%s531_s0] sm:$0xff]  ;;  %v33_v1 = vld [vmem:[%s531_s0 + $0x8] sm:$0xff] }
   0x2   :  { %v35_v2 = vsel %vm34_vm0, %v32_v0, 0.0  ;;  %v38_v3 = vsel %vm34_vm0, %v33_v1, 0.0 }
   0x3   :  { %36 = vadd.xlane.f32.xlu0 %v35_v2 }
   0x7   :  { %39 = vadd.xlane.f32.xlu0 %v38_v3 }
   0x8   :  { %12 = vsyncpa [#allocation5], 0  ;;  %v383_v14 = vld [vmem:[%s534_s3 + $0x8] sm:$0xff]   ;;  %v424_v15 = vmov 0.0   ;;  %vm425_vm1 = vmmov 0   ;;  %v384_v16 = vld [vmem:[%s534_s3] sm:$0xff]   ;;  %v101_v44 = vlaneseq }
   0x9   :  { %350 = vmatprep.subr.bf16.mxu0 %v424_v15  ;;  %91 = vst.msk [vmem:[#allocation3] sm:$0xff] %vm34_vm0, %v424_v15  ;;  %92 = vst.msk [vmem:[#allocation3 + $0x8] sm:$0xff] %vm34_vm0, %v424_v15  ;;  %354 = vmatprep.mubr.msk.bf16.mxu0 %vm425_vm1, %v424_v15  ;;  %v386_v17 = vld [vmem:[%s536_s5 + $0x38] sm:$0xff]   ;;  %v320_v25 = vld [vmem:[%s532_s1] ss:$0 sm:$0xff]  ;;  %vm88_vm2 = vcmask 257024  }
   0xa   :  { %351 = vmatpush3.bf16.msra.mxu0 %v383_v14  ;;  %358 = vmatprep.subr.bf16.mxu1 %v424_v15  ;;  %v321_v27 = vld [vmem:[%s533_s2] ss:$0 sm:$0xff]  ;;  %v387_v37 = vld [vmem:[%s536_s5 + $0x30] sm:$0xff]   ;;  %v388_v38 = vld [vmem:[%s536_s5 + $0x28] sm:$0xff]   ;;  %v102_v45 = vshrl.u32 %v101_v44, 7  ;;  %s426_s27 = smov [#allocation4]  }
   0xb   :  { %352 = vmatprep.subr.bf16.mxu0 %v424_v15  ;;  %374 = vmatprep.mubr.msk.bf16.mxu1 %vm425_vm1, %v424_v15  ;;  %v389_v39 = vld [vmem:[%s536_s5 + $0x20] sm:$0xff]   ;;  %v390_v40 = vld [vmem:[%s536_s5 + $0x18] sm:$0xff]   ;;  %v391_v41 = vld [vmem:[%s536_s5 + $0x10] sm:$0xff]   ;;  %s309_s0 = sshll.u32 %s426_s27, 4  ;;  %s310_s0 = int_to_ptr.vmem [resolvable:$true] %s309_s0 }
   0xc   :  { %359 = vmatpush3.bf16.msra.mxu1 %v386_v17  ;;  %v392_v42 = vld [vmem:[%s536_s5 + $0x8] sm:$0xff]   ;;  %v393_v43 = vld [vmem:[%s536_s5] sm:$0xff]   ;;  %v103_v48 = vsub.s32 0, %v102_v45  ;;  %p407_p1 = scmp.lt.s32.totalorder %s310_s0, %s310_s0 }
   0xd   :  { %360 = vmatprep.subr.bf16.mxu1 %v424_v15  ;;  %v99_v46 = vld [vmem:[%s535_s4] sm:$0x1] }
   0xe   :  { %353 = vmatpush3.bf16.msra.mxu0 %v384_v16  ;;  %v100_v47 = vunpack.c.l.bf16 %v99_v46 }
  0x10   :  { %361 = vmatpush3.bf16.msra.mxu1 %v387_v37  ;;  %v104_v49 = vrot.slane %v100_v47, %v103_v48  ;;  %v177_v3 = vld [vmem:[#allocation3] sm:$0xff] }
  0x11   :  { %362 = vmatprep.subr.bf16.mxu1 %v424_v15 }
  0x14   :  { %363 = vmatpush3.bf16.msra.mxu1 %v388_v38 }
  0x15   :  { %364 = vmatprep.subr.bf16.mxu1 %v424_v15 }
  0x18   :  { %365 = vmatpush3.bf16.msra.mxu1 %v389_v39 }
  0x19   :  { %366 = vmatprep.subr.bf16.mxu1 %v424_v15 }
  0x1c   :  { %367 = vmatpush3.bf16.msra.mxu1 %v390_v40 }
  0x1d   :  { %368 = vmatprep.subr.bf16.mxu1 %v424_v15 }
  0x20   :  { %369 = vmatpush3.bf16.msra.mxu1 %v391_v41 }
  0x21   :  { %370 = vmatprep.subr.bf16.mxu1 %v424_v15 }
  0x24   :  { %371 = vmatpush3.bf16.msra.mxu1 %v392_v42 }
  0x25   :  { %372 = vmatprep.subr.bf16.mxu1 %v424_v15 }
  0x28   :  { %373 = vmatpush3.bf16.msra.mxu1 %v393_v43 }
  0x8c   :  { %v37_v4 = vpop.xlane.xlu0 %36 }
  0x8d   :  { %v42_v5 = vmul.f32 0.03125, %v37_v4  ;;  %v294_v4 = vld [vmem:[%s537_s6] sm:$0x1]  ;;  %s402_s6 = scalar_lea.vmem %s310_s0, 256 }
  0x8e   :  { %p403_p0 = scmp.ne.s32.totalorder %s310_s0, %s402_s6  ;;  %p408_p2 = scmp.lt.s32.totalorder %s402_s6, %s402_s6 }
  0x8f   :  { %v44_v6 = vsub.f32 %v32_v0, %v42_v5 }
  0x90   :  { %v40_v7 = vpop.xlane.xlu0 %39  ;;  %p409_p3 = por %p408_p2, %p407_p1 }
  0x91   :  { %v43_v8 = vmul.f32 0.03125, %v40_v7  ;;  %v46_v9 = vmul.f32 %v44_v6, %v44_v6 }
  0x92   :  { %p410_p4 = pnand %p409_p3, %p403_p0 }
  0x93   :  { %v45_v10 = vsub.f32 %v33_v1, %v43_v8  ;;  %v48_v11 = vsel %vm34_vm0, %v46_v9, 0.0  ;;  %v178_v8 = vld [vmem:[#allocation3 + $0x8] sm:$0xff]  ;;  %v295_v9 = vunpack.c.l.bf16 %v294_v4 }
  0x94   :  { %49 = vadd.xlane.f32.xlu1 %v48_v11 }
  0x95   :  { %v47_v12 = vmul.f32 %v45_v10, %v45_v10 }
  0x97   :  { %v51_v13 = vsel %vm34_vm0, %v47_v12, 0.0 }
  0x98   :  { %52 = vadd.xlane.f32.xlu1 %v51_v13  ;;  %v299_v13 = vrot.slane %v295_v9, %v103_v48 }
 0x11d   :  { %v50_v18 = vpop.xlane.xlu1 %49 }
 0x11e   :  { %v54_v19 = vmul.f32 0.03125, %v50_v18 }
 0x120   :  { %v56_v20 = vadd.f32 1e-05, %v54_v19 }
 0x121   :  { %v53_v21 = vpop.xlane.xlu1 %52 }
 0x122   :  { %394 = vrsqrt.f32 %v56_v20  ;;  %v55_v22 = vmul.f32 0.03125, %v53_v21 }
 0x124   :  { %v57_v23 = vadd.f32 1e-05, %v55_v22 }
 0x126   :  { %396 = vrsqrt.f32 %v57_v23 }
 0x12f   :  { %v395_v24 = vpop.eup %394 }
 0x130   :  { %v60_v26 = vmul.f32 %v395_v24, %v44_v6 }
 0x132   :  { %v69_v28 = vmul.f32 %v320_v25, %v60_v26 }
 0x133   :  { %v397_v29 = vpop.eup %396 }
 0x134   :  { %v78_v30 = vadd.f32 %v321_v27, %v69_v28  ;;  %v61_v31 = vmul.f32 %v397_v29, %v45_v10 }
 0x136   :  { %v336_v32 = vpack.c.bf16 %v78_v30, %v78_v30  ;;  %v70_v33 = vmul.f32 %v320_v25, %v61_v31 }
 0x138   :  { %89 = vst.msk [vmem:[#allocation2] sm:$0xf] %vm88_vm2, %v336_v32  ;;  %v79_v34 = vadd.f32 %v321_v27, %v70_v33 }
 0x13a   :  { %v337_v35 = vpack.c.bf16 %v79_v34, %v79_v34 }
 0x13c   :  { %90 = vst.msk [vmem:[#allocation2 + $0x4] sm:$0xf] %vm88_vm2, %v337_v35 }
 0x143   :  { %v385_v36 = vld [vmem:[#allocation2] sm:$0xff]  }
 0x144   :  { %355 = vmatmul.mubr.msk.bf16.vlgmr.msra.gmra.mxu0 %vm34_vm0, %v385_v36 }
 0x204   :  { %v160_v50 = vpop.f32.mrf.mxu0 }
 0x205   :  { %v161_v51 = vadd.f32 %v160_v50, %v104_v49 }
 0x206   :  { %v356_v52 = vpop.f32.mrf.mxu0 }
 0x207   :  { %v169_v53 = vmul.f32 0.70710677, %v161_v51  ;;  %v167_v61 = vmul.f32 0.5, %v161_v51 }
 0x208   :  { %v163_v54 = vpop.f32.mrf.mxu0 }
 0x209   :  { %398 = verf.f32 %v169_v53  ;;  %v164_v55 = vadd.f32 %v163_v54, %v104_v49 }
 0x20a   :  { %v357_v56 = vpop.f32.mrf.mxu0 }
 0x20b   :  { %v170_v57 = vmul.f32 0.70710677, %v164_v55  ;;  %v168_v62 = vmul.f32 0.5, %v164_v55 }
 0x20d   :  { %400 = verf.f32 %v170_v57 }
 0x216   :  { %v399_v58 = vpop.eup %398 }
 0x217   :  { %v173_v59 = vadd.f32 1.0, %v399_v58 }
 0x219   :  { %v175_v0 = vmul.f32 %v173_v59, %v167_v61 }
 0x21a   :  { %v401_v60 = vpop.eup %400 }
 0x21b   :  { %v174_v63 = vadd.f32 1.0, %v401_v60 }
 0x21d   :  { %v176_v1 = vmul.f32 %v174_v63, %v168_v62 }
 0x21f   :  { %v179_v2 = vpack.c.bf16 %v176_v1, %v175_v0 }
 0x221   :  { %375 = vmatmul.mubr.bf16.vlgmr.msra.gmra.mxu1 %v179_v2 }
 0x2e1   :  { %v278_v5 = vpop.f32.mrf.mxu1 }
 0x2e2   :  { %v285_v6 = vadd.f32 %v278_v5, %v177_v3 }
 0x2e3   :  { %v376_v7 = vpop.f32.mrf.mxu1 }
 0x2e4   :  { %287 = vst.msk [vmem:[#allocation3] sm:$0xff] %vm34_vm0, %v285_v6 }
 0x2e5   :  { %v281_v10 = vpop.f32.mrf.mxu1 }
 0x2e6   :  { %v286_v11 = vadd.f32 %v281_v10, %v178_v8 }
 0x2e7   :  { %v377_v12 = vpop.f32.mrf.mxu1 }
 0x2e8   :  { %288 = vst.msk [vmem:[#allocation3 + $0x8] sm:$0xff] %vm34_vm0, %v286_v11 }
 0x2eb   :  { %v292_v14 = vld [vmem:[#allocation3] sm:$0xff] }
 0x2ec   :  { %v300_v15 = vadd.f32 %v299_v13, %v292_v14 }
 0x2ee   :  { %302 = vst.msk [vmem:[#allocation4] sm:$0xff] %vm34_vm0, %v300_v15 }
 0x2ef   :  { %v293_v16 = vld [vmem:[#allocation3 + $0x8] sm:$0xff] }
 0x2f0   :  { %v301_v17 = vadd.f32 %v299_v13, %v293_v16 }
 0x2f2   :  { %303 = vst.msk [vmem:[#allocation4 + $0x8] sm:$0xff] %vm34_vm0, %v301_v17 }
 0x2f3   :  { %413 = shalt.err (!%p410_p4)
}
 0x2f4   :  { %s427_s28 = smov 128   ;;  %s428_s29 = smov 8  }
 0x2f5   :  { %315 = dma.vmem_to_hbm [thread:$0]  %s310_s0, 256, %s538_s7, [#allocation5], %s427_s28, %s427_s28, %s428_s29  }
 0x2f6   :  { %422 = dma.done.wait [#allocation5], 256  }
 0x2f7   :  { %423 = vsyncadd [#allocation5], 4294967040 }
 0x2f8   :  { %319 = vsyncpa [#allocation5], 1 }

// kernel: tpu_custom_call.1
= control target key start
LH: loop header
LB: loop body
LE: loop exit
PB: predicated region body
PF: predicated region fallthrough
CT: control target
= control target key end

     0   :  { %vm34_vm0 = vcmask 261120   ;;  %s531_s0 = inlined_call_operand.vmem [shape: f32[16,32], index: 0, kind: input, shape index: {}]   ;;  %s532_s1 = inlined_call_operand.vmem [shape: f32[1,32], index: 1, kind: input, shape index: {}]   ;;  %s533_s2 = inlined_call_operand.vmem [shape: f32[1,32], index: 2, kind: input, shape index: {}]   ;;  %s534_s3 = inlined_call_operand.vmem [shape: bf16[32,128], index: 3, kind: input, shape index: {}]   ;;  %s535_s4 = inlined_call_operand.vmem [shape: bf16[1,128], index: 4, kind: input, shape index: {}]   ;;  %s536_s5 = inlined_call_operand.vmem [shape: bf16[128,32], index: 5, kind: input, shape index: {}]   ;;  %s537_s6 = inlined_call_operand.vmem [shape: bf16[1,32], index: 6, kind: input, shape index: {}]   ;;  %s538_s7 = inlined_call_operand.hbm [shape: f32[16,32], index: 7, kind: output, shape index: {}]  }
   0x1   :  { %v32_v0 = vld [vmem:[%s531_s0] sm:$0xff]  ;;  %v33_v1 = vld [vmem:[%s531_s0 + $0x8] sm:$0xff] }
   0x2   :  { %v35_v2 = vsel %vm34_vm0, %v32_v0, 0.0  ;;  %v38_v3 = vsel %vm34_vm0, %v33_v1, 0.0 }
   0x3   :  { %36 = vadd.xlane.f32.xlu0 %v35_v2 }
   0x7   :  { %39 = vadd.xlane.f32.xlu0 %v38_v3 }
   0x8   :  { %12 = vsyncpa [#allocation5], 0  ;;  %v383_v14 = vld [vmem:[%s534_s3 + $0x8] sm:$0xff]   ;;  %v424_v15 = vmov 0.0   ;;  %vm425_vm1 = vmmov 0   ;;  %v384_v16 = vld [vmem:[%s534_s3] sm:$0xff]   ;;  %v101_v44 = vlaneseq }
   0x9   :  { %350 = vmatprep.subr.bf16.mxu0 %v424_v15  ;;  %91 = vst.msk [vmem:[#allocation3] sm:$0xff] %vm34_vm0, %v424_v15  ;;  %92 = vst.msk [vmem:[#allocation3 + $0x8] sm:$0xff] %vm34_vm0, %v424_v15  ;;  %354 = vmatprep.mubr.msk.bf16.mxu0 %vm425_vm1, %v424_v15  ;;  %v386_v17 = vld [vmem:[%s536_s5 + $0x38] sm:$0xff]   ;;  %v320_v25 = vld [vmem:[%s532_s1] ss:$0 sm:$0xff]  ;;  %vm88_vm2 = vcmask 257024  }
   0xa   :  { %351 = vmatpush3.bf16.msra.mxu0 %v383_v14  ;;  %358 = vmatprep.subr.bf16.mxu1 %v424_v15  ;;  %v321_v27 = vld [vmem:[%s533_s2] ss:$0 sm:$0xff]  ;;  %v387_v37 = vld [vmem:[%s536_s5 + $0x30] sm:$0xff]   ;;  %v388_v38 = vld [vmem:[%s536_s5 + $0x28] sm:$0xff]   ;;  %v102_v45 = vshrl.u32 %v101_v44, 7  ;;  %s426_s27 = smov [#allocation4]  }
   0xb   :  { %352 = vmatprep.subr.bf16.mxu0 %v424_v15  ;;  %374 = vmatprep.mubr.msk.bf16.mxu1 %vm425_vm1, %v424_v15  ;;  %v389_v39 = vld [vmem:[%s536_s5 + $0x20] sm:$0xff]   ;;  %v390_v40 = vld [vmem:[%s536_s5 + $0x18] sm:$0xff]   ;;  %v391_v41 = vld [vmem:[%s536_s5 + $0x10] sm:$0xff]   ;;  %s309_s0 = sshll.u32 %s426_s27, 4  ;;  %s310_s0 = int_to_ptr.vmem [resolvable:$true] %s309_s0 }
   0xc   :  { %359 = vmatpush3.bf16.msra.mxu1 %v386_v17  ;;  %v392_v42 = vld [vmem:[%s536_s5 + $0x8] sm:$0xff]   ;;  %v393_v43 = vld [vmem:[%s536_s5] sm:$0xff]   ;;  %v103_v48 = vsub.s32 0, %v102_v45  ;;  %p407_p1 = scmp.lt.s32.totalorder %s310_s0, %s310_s0 }
   0xd   :  { %360 = vmatprep.subr.bf16.mxu1 %v424_v15  ;;  %v99_v46 = vld [vmem:[%s535_s4] sm:$0x1] }
   0xe   :  { %353 = vmatpush3.bf16.msra.mxu0 %v384_v16  ;;  %v100_v47 = vunpack.c.l.bf16 %v99_v46 }
  0x10   :  { %361 = vmatpush3.bf16.msra.mxu1 %v387_v37  ;;  %v104_v49 = vrot.slane %v100_v47, %v103_v48  ;;  %v177_v3 = vld [vmem:[#allocation3] sm:$0xff] }
  0x11   :  { %362 = vmatprep.subr.bf16.mxu1 %v424_v15 }
  0x14   :  { %363 = vmatpush3.bf16.msra.mxu1 %v388_v38 }
  0x15   :  { %364 = vmatprep.subr.bf16.mxu1 %v424_v15 }
  0x18   :  { %365 = vmatpush3.bf16.msra.mxu1 %v389_v39 }
  0x19   :  { %366 = vmatprep.subr.bf16.mxu1 %v424_v15 }
  0x1c   :  { %367 = vmatpush3.bf16.msra.mxu1 %v390_v40 }
  0x1d   :  { %368 = vmatprep.subr.bf16.mxu1 %v424_v15 }
  0x20   :  { %369 = vmatpush3.bf16.msra.mxu1 %v391_v41 }
  0x21   :  { %370 = vmatprep.subr.bf16.mxu1 %v424_v15 }
  0x24   :  { %371 = vmatpush3.bf16.msra.mxu1 %v392_v42 }
  0x25   :  { %372 = vmatprep.subr.bf16.mxu1 %v424_v15 }
  0x28   :  { %373 = vmatpush3.bf16.msra.mxu1 %v393_v43 }
  0x8c   :  { %v37_v4 = vpop.xlane.xlu0 %36 }
  0x8d   :  { %v42_v5 = vmul.f32 0.03125, %v37_v4  ;;  %v294_v4 = vld [vmem:[%s537_s6] sm:$0x1]  ;;  %s402_s6 = scalar_lea.vmem %s310_s0, 256 }
  0x8e   :  { %p403_p0 = scmp.ne.s32.totalorder %s310_s0, %s402_s6  ;;  %p408_p2 = scmp.lt.s32.totalorder %s402_s6, %s402_s6 }
  0x8f   :  { %v44_v6 = vsub.f32 %v32_v0, %v42_v5 }
  0x90   :  { %v40_v7 = vpop.xlane.xlu0 %39  ;;  %p409_p3 = por %p408_p2, %p407_p1 }
  0x91   :  { %v43_v8 = vmul.f32 0.03125, %v40_v7  ;;  %v46_v9 = vmul.f32 %v44_v6, %v44_v6 }
  0x92   :  { %p410_p4 = pnand %p409_p3, %p403_p0 }
  0x93   :  { %v45_v10 = vsub.f32 %v33_v1, %v43_v8  ;;  %v48_v11 = vsel %vm34_vm0, %v46_v9, 0.0  ;;  %v178_v8 = vld [vmem:[#allocation3 + $0x8] sm:$0xff]  ;;  %v295_v9 = vunpack.c.l.bf16 %v294_v4 }
  0x94   :  { %49 = vadd.xlane.f32.xlu1 %v48_v11 }
  0x95   :  { %v47_v12 = vmul.f32 %v45_v10, %v45_v10 }
  0x97   :  { %v51_v13 = vsel %vm34_vm0, %v47_v12, 0.0 }
  0x98   :  { %52 = vadd.xlane.f32.xlu1 %v51_v13  ;;  %v299_v13 = vrot.slane %v295_v9, %v103_v48 }
 0x11d   :  { %v50_v18 = vpop.xlane.xlu1 %49 }
 0x11e   :  { %v54_v19 = vmul.f32 0.03125, %v50_v18 }
 0x120   :  { %v56_v20 = vadd.f32 1e-05, %v54_v19 }
 0x121   :  { %v53_v21 = vpop.xlane.xlu1 %52 }
 0x122   :  { %394 = vrsqrt.f32 %v56_v20  ;;  %v55_v22 = vmul.f32 0.03125, %v53_v21 }
 0x124   :  { %v57_v23 = vadd.f32 1e-05, %v55_v22 }
 0x126   :  { %396 = vrsqrt.f32 %v57_v23 }
 0x12f   :  { %v395_v24 = vpop.eup %394 }
 0x130   :  { %v60_v26 = vmul.f32 %v395_v24, %v44_v6 }
 0x132   :  { %v69_v28 = vmul.f32 %v320_v25, %v60_v26 }
 0x133   :  { %v397_v29 = vpop.eup %396 }
 0x134   :  { %v78_v30 = vadd.f32 %v321_v27, %v69_v28  ;;  %v61_v31 = vmul.f32 %v397_v29, %v45_v10 }
 0x136   :  { %v336_v32 = vpack.c.bf16 %v78_v30, %v78_v30  ;;  %v70_v33 = vmul.f32 %v320_v25, %v61_v31 }
 0x138   :  { %89 = vst.msk [vmem:[#allocation2] sm:$0xf] %vm88_vm2, %v336_v32  ;;  %v79_v34 = vadd.f32 %v321_v27, %v70_v33 }
 0x13a   :  { %v337_v35 = vpack.c.bf16 %v79_v34, %v79_v34 }
 0x13c   :  { %90 = vst.msk [vmem:[#allocation2 + $0x4] sm:$0xf] %vm88_vm2, %v337_v35 }
 0x143   :  { %v385_v36 = vld [vmem:[#allocation2] sm:$0xff]  }
 0x144   :  { %355 = vmatmul.mubr.msk.bf16.vlgmr.msra.gmra.mxu0 %vm34_vm0, %v385_v36 }
 0x204   :  { %v160_v50 = vpop.f32.mrf.mxu0 }
 0x205   :  { %v161_v51 = vadd.f32 %v160_v50, %v104_v49 }
 0x206   :  { %v356_v52 = vpop.f32.mrf.mxu0 }
 0x207   :  { %v169_v53 = vmul.f32 0.70710677, %v161_v51  ;;  %v167_v61 = vmul.f32 0.5, %v161_v51 }
 0x208   :  { %v163_v54 = vpop.f32.mrf.mxu0 }
 0x209   :  { %398 = verf.f32 %v169_v53  ;;  %v164_v55 = vadd.f32 %v163_v54, %v104_v49 }
 0x20a   :  { %v357_v56 = vpop.f32.mrf.mxu0 }
 0x20b   :  { %v170_v57 = vmul.f32 0.70710677, %v164_v55  ;;  %v168_v62 = vmul.f32 0.5, %v164_v55 }
 0x20d   :  { %400 = verf.f32 %v170_v57 }
 0x216   :  { %v399_v58 = vpop.eup %398 }
 0x217   :  { %v173_v59 = vadd.f32 1.0, %v399_v58 }
 0x219   :  { %v175_v0 = vmul.f32 %v173_v59, %v167_v61 }
 0x21a   :  { %v401_v60 = vpop.eup %400 }
 0x21b   :  { %v174_v63 = vadd.f32 1.0, %v401_v60 }
 0x21d   :  { %v176_v1 = vmul.f32 %v174_v63, %v168_v62 }
 0x21f   :  { %v179_v2 = vpack.c.bf16 %v176_v1, %v175_v0 }
 0x221   :  { %375 = vmatmul.mubr.bf16.vlgmr.msra.gmra.mxu1 %v179_v2 }
 0x2e1   :  { %v278_v5 = vpop.f32.mrf.mxu1 }
 0x2e2   :  { %v285_v6 = vadd.f32 %v278_v5, %v177_v3 }
 0x2e3   :  { %v376_v7 = vpop.f32.mrf.mxu1 }
 0x2e4   :  { %287 = vst.msk [vmem:[#allocation3] sm:$0xff] %vm34_vm0, %v285_v6 }
 0x2e5   :  { %v281_v10 = vpop.f32.mrf.mxu1 }
 0x2e6   :  { %v286_v11 = vadd.f32 %v281_v10, %v178_v8 }
 0x2e7   :  { %v377_v12 = vpop.f32.mrf.mxu1 }
 0x2e8   :  { %288 = vst.msk [vmem:[#allocation3 + $0x8] sm:$0xff] %vm34_vm0, %v286_v11 }
 0x2eb   :  { %v292_v14 = vld [vmem:[#allocation3] sm:$0xff] }
 0x2ec   :  { %v300_v15 = vadd.f32 %v299_v13, %v292_v14 }
 0x2ee   :  { %302 = vst.msk [vmem:[#allocation4] sm:$0xff] %vm34_vm0, %v300_v15 }
 0x2ef   :  { %v293_v16 = vld [vmem:[#allocation3 + $0x8] sm:$0xff] }
 0x2f0   :  { %v301_v17 = vadd.f32 %v299_v13, %v293_v16 }
 0x2f2   :  { %303 = vst.msk [vmem:[#allocation4 + $0x8] sm:$0xff] %vm34_vm0, %v301_v17 }
 0x2f3   :  { %413 = shalt.err (!%p410_p4)
}
 0x2f4   :  { %s427_s28 = smov 128   ;;  %s428_s29 = smov 8  }
 0x2f5   :  { %315 = dma.vmem_to_hbm [thread:$0]  %s310_s0, 256, %s538_s7, [#allocation5], %s427_s28, %s427_s28, %s428_s29  }
 0x2f6   :  { %422 = dma.done.wait [#allocation5], 256  }
 0x2f7   :  { %423 = vsyncadd [#allocation5], 4294967040 }
 0x2f8   :  { %319 = vsyncpa [#allocation5], 1 }

</bundles_post_ra>
